<compile_context>
chip_gen: v5e
topology: v5e:2x2
jax: 0.10.0
libtpu: 0.0.40
codegen_flags: <defaults>
</compile_context>

<pallas_src>
import functools

import jax
import jax.numpy as jnp
import numpy as np
from jax.experimental import pallas as pl
from jax.experimental.pallas import tpu as pltpu


def _round_up(x, m):
    return ((x + m - 1) // m) * m


def _lstm_kernel(maxlen_ref, lens_ref, x_ref, w_ref, b_ref, hout_ref, c_ref,
                 *, t_block, h_pad):
    """One (batch-block, time-block) grid step of the LSTM recurrence.

    maxlen_ref : (1,) int32 in SMEM (scalar prefetch)
    lens_ref   : (B_blk, 1) int32         per-row valid lengths
    x_ref      : (T_blk, B_blk, E_pad)    time-major input slab
    w_ref      : (E_pad + H_pad, 4*H_pad) fused [W_ih^T ; W_hh^T], gate-aligned cols
    b_ref      : (1, 4*H_pad)             fused bias, gate-aligned
    hout_ref   : (B_blk, H_pad)           output block == resident h state
    c_ref      : (B_blk, H_pad)           VMEM scratch == resident c state
    """
    tb = pl.program_id(1)
    b_blk = hout_ref.shape[0]

    @pl.when(tb == 0)
    def _():
        hout_ref[...] = jnp.zeros_like(hout_ref)
        c_ref[...] = jnp.zeros_like(c_ref)

    t0 = tb * t_block
    # Skip timesteps beyond the longest sequence in the batch (padding tail).
    n_steps = jnp.clip(maxlen_ref[0] - t0, 0, t_block)

    lens = lens_ref[...]                                        # (B_blk, 1) int32
    w = w_ref[...]                                              # (E_pad+H_pad, 4*H_pad)
    bias = jnp.broadcast_to(b_ref[...], (b_blk, 4 * h_pad))     # hoisted out of loop

    def step(i, carry):
        h, c = carry                                            # (B_blk, H_pad) each, f32
        x_t = x_ref[i]                                          # (B_blk, E_pad)
        xh = jnp.concatenate([x_t, h], axis=1)                  # (B_blk, E_pad+H_pad)
        gates = jnp.dot(xh, w, preferred_element_type=jnp.float32) + bias
        # PyTorch gate order i | f | g | o, each in its own 128-lane-aligned group.
        i_g = jax.nn.sigmoid(gates[:, 0 * h_pad:1 * h_pad])
        f_g = jax.nn.sigmoid(gates[:, 1 * h_pad:2 * h_pad])
        g_g = jnp.tanh(gates[:, 2 * h_pad:3 * h_pad])
        o_g = jax.nn.sigmoid(gates[:, 3 * h_pad:4 * h_pad])
        c_new = f_g * c + i_g * g_g
        h_new = o_g * jnp.tanh(c_new)
        # Hold (h, c) once a row's sequence is exhausted -> h at end == packed h_n.
        valid = (t0 + i) < lens                                 # (B_blk, 1) bool
        return jnp.where(valid, h_new, h), jnp.where(valid, c_new, c)

    h_n, c_n = jax.lax.fori_loop(0, n_steps, step,
                                 (hout_ref[...], c_ref[...]))
    hout_ref[...] = h_n
    c_ref[...] = c_n


def lstm_forward_pallas(indices, embedding_matrix, w_ih, w_hh, b_ih, b_hh,
                        w_dense, b_dense):
    """indices: (B, T) int32. Returns (B, P) float32. Mirrors LSTM.forward."""
    B, T = indices.shape
    E = embedding_matrix.shape[1]
    H = w_hh.shape[1]
    f32 = jnp.float32

    # ---- tile / padding geometry ------------------------------------------
    b8 = _round_up(max(B, 1), 8)                 # f32 sublane multiple
    if b8 <= 128:
        B_blk, B_pad = b8, b8
    else:
        B_blk, B_pad = 128, _round_up(B, 128)
    E_pad = _round_up(max(E, 1), 128)
    H_pad = _round_up(max(H, 1), 128)
    T_blk = min(max(T, 1), 128)
    T_pad = _round_up(max(T, 1), T_blk)

    # ---- plain-JAX glue: embedding gather + lengths ------------------------
    x = jnp.take(jnp.asarray(embedding_matrix, f32), indices, axis=0)   # (B,T,E)
    x_len = jnp.sum(indices != 0, axis=-1).astype(jnp.int32)            # (B,)

    # Time-major, padded to the tile grid.
    x_tm = jnp.transpose(x, (1, 0, 2))                                  # (T,B,E)
    x_tm = jnp.pad(x_tm, ((0, T_pad - T), (0, B_pad - B), (0, E_pad - E)))
    lens = jnp.pad(x_len, (0, B_pad - B)).reshape(B_pad, 1)
    max_len = jnp.max(x_len, initial=0).astype(jnp.int32).reshape(1)

    # ---- fused, gate-aligned parameters ------------------------------------
    w_ih = jnp.asarray(w_ih, f32)                      # (4H, E)
    w_hh = jnp.asarray(w_hh, f32)                      # (4H, H)
    bias = jnp.asarray(b_ih, f32) + jnp.asarray(b_hh, f32)              # (4H,)
    w_cat = jnp.zeros((E_pad + H_pad, 4 * H_pad), f32)
    b_cat = jnp.zeros((1, 4 * H_pad), f32)
    for g in range(4):                                 # gates i|f|g|o
        w_cat = w_cat.at[:E, g * H_pad:g * H_pad + H].set(
            w_ih[g * H:(g + 1) * H, :].T)
        w_cat = w_cat.at[E_pad:E_pad + H, g * H_pad:g * H_pad + H].set(
            w_hh[g * H:(g + 1) * H, :].T)
        b_cat = b_cat.at[0, g * H_pad:g * H_pad + H].set(bias[g * H:(g + 1) * H])
    # TODO(synk): on v6e/v7x, cast x_tm / w_cat to bfloat16 (f32 accumulation is
    # kept via preferred_element_type) for ~2x MXU throughput and half the VMEM.

    kernel = functools.partial(_lstm_kernel, t_block=T_blk, h_pad=H_pad)
    grid = (B_pad // B_blk, T_pad // T_blk)

    h_full = pl.pallas_call(
        kernel,
        out_shape=jax.ShapeDtypeStruct((B_pad, H_pad), f32),
        grid_spec=pltpu.PrefetchScalarGridSpec(
            num_scalar_prefetch=1,                               # max_len -> SMEM
            grid=grid,
            in_specs=[
                pl.BlockSpec((B_blk, 1), lambda b, t, ml: (b, 0)),               # lens
                pl.BlockSpec((T_blk, B_blk, E_pad), lambda b, t, ml: (t, b, 0)), # x slab
                pl.BlockSpec((E_pad + H_pad, 4 * H_pad), lambda b, t, ml: (0, 0)),  # W_cat
                pl.BlockSpec((1, 4 * H_pad), lambda b, t, ml: (0, 0)),           # bias
            ],
            out_specs=pl.BlockSpec((B_blk, H_pad), lambda b, t, ml: (b, 0)),     # h_n
            scratch_shapes=[pltpu.VMEM((B_blk, H_pad), f32)],                    # c state
        ),
        compiler_params=pltpu.CompilerParams(
            dimension_semantics=("parallel", "arbitrary")),   # batch || , time sequential
    )(max_len, lens, x_tm, w_cat, b_cat)

    # Lane-sparse (P=3) dense projection stays outside the kernel (XLA handles it).
    h_n = h_full[:B, :H]
    return h_n @ jnp.asarray(w_dense, f32).T + jnp.asarray(b_dense, f32)


def _reference(indices, embedding_matrix, w_ih, w_hh, b_ih, b_hh, w_dense, b_dense):
    """Pure-JAX reference for the same forward pass."""
    B, T = indices.shape
    H = w_hh.shape[1]
    x = jnp.take(embedding_matrix, indices, axis=0)
    x_len = jnp.sum(indices != 0, axis=-1)

    def step(carry, t):
        h, c = carry
        x_t = x[:, t, :]
        gates = x_t @ w_ih.T + b_ih + h @ w_hh.T + b_hh
        i = jax.nn.sigmoid(gates[:, 0:H])
        f = jax.nn.sigmoid(gates[:, H:2 * H])
        g = jnp.tanh(gates[:, 2 * H:3 * H])
        o = jax.nn.sigmoid(gates[:, 3 * H:4 * H])
        c_new = f * c + i * g
        h_new = o * jnp.tanh(c_new)
        mask = (t < x_len)[:, None]
        h = jnp.where(mask, h_new, h)
        c = jnp.where(mask, c_new, c)
        return (h, c), None

    h0 = jnp.zeros((B, H), jnp.float32)
    c0 = jnp.zeros((B, H), jnp.float32)
    (h_n, _), _ = jax.lax.scan(step, (h0, c0), jnp.arange(T))
    return h_n @ w_dense.T + b_dense


if __name__ == "__main__":
    # Small shapes consistent with the module's forward.
    B, T = 2, 8            # batch, seq len
    V, E = 20, 32          # vocab, embed_dim
    H, P = 32, 3           # hidden_dim, polarities_dim

    key = jax.random.PRNGKey(0)
    k_emb, k_idx, k_wih, k_whh, k_bih, k_bhh, k_wd, k_bd = jax.random.split(key, 8)

    embedding_matrix = jax.random.normal(k_emb, (V, E), jnp.float32) * 0.1
    # Token indices in [1, V); zero-pad tails to create variable lengths (5 and 8).
    indices = jax.random.randint(k_idx, (B, T), 1, V, dtype=jnp.int32)
    indices = indices.at[0, 5:].set(0)

    s = 1.0 / np.sqrt(H)
    w_ih = jax.random.uniform(k_wih, (4 * H, E), jnp.float32, -s, s)
    w_hh = jax.random.uniform(k_whh, (4 * H, H), jnp.float32, -s, s)
    b_ih = jax.random.uniform(k_bih, (4 * H,), jnp.float32, -s, s)
    b_hh = jax.random.uniform(k_bhh, (4 * H,), jnp.float32, -s, s)
    sd = 1.0 / np.sqrt(H)
    w_dense = jax.random.uniform(k_wd, (P, H), jnp.float32, -sd, sd)
    b_dense = jax.random.uniform(k_bd, (P,), jnp.float32, -sd, sd)

    out = lstm_forward_pallas(indices, embedding_matrix, w_ih, w_hh,
                              b_ih, b_hh, w_dense, b_dense)
    out = jax.block_until_ready(out)

    ref = _reference(indices, embedding_matrix, w_ih, w_hh, b_ih, b_hh,
                     w_dense, b_dense)
    np.testing.assert_allclose(np.asarray(out), np.asarray(ref),
                               rtol=1e-4, atol=1e-4)
    print("KERNEL_OK")
</pallas_src>

<mosaic_0001>
module attributes {stable_mosaic.version = 11 : i64} {
  func.func @_lstm_kernel(%arg0: i32, %arg1: i32, %arg2: memref<1xi32, #tpu.memory_space<smem>>, %arg3: memref<8x1xi32, #tpu.memory_space<vmem>>, %arg4: memref<8x8x128xf32, #tpu.memory_space<vmem>>, %arg5: memref<256x512xf32, #tpu.memory_space<vmem>>, %arg6: memref<1x512xf32, #tpu.memory_space<vmem>>, %arg7: memref<8x128xf32, #tpu.memory_space<vmem>>, %arg8: memref<8x128xf32, #tpu.memory_space<vmem>>) attributes {dimension_semantics = [#tpu.dimension_semantics<parallel>, #tpu.dimension_semantics<arbitrary>], iteration_bounds = array<i64: 1, 1>, scalar_prefetch = 1 : i64, scratch_operands = 1 : i64, tpu.core_type = #tpu.core_type<tc>, window_params = [{transform_indices = @transform_0, window_bounds = array<i64: 8, 1>}, {transform_indices = @transform_1, window_bounds = array<i64: 8, 8, 128>}, {pipeline_mode = #tpu.pipeline_mode<synchronous>, transform_indices = @transform_2, window_bounds = array<i64: 256, 512>}, {pipeline_mode = #tpu.pipeline_mode<synchronous>, transform_indices = @transform_3, window_bounds = array<i64: 1, 512>}, {transform_indices = @transform_4, window_bounds = array<i64: 8, 128>}]} {
    %c0_i32 = arith.constant 0 : i32
    %0 = arith.cmpi eq, %arg1, %c0_i32 : i32
    %1 = arith.extui %0 : i1 to i32
    %c0_i32_0 = arith.constant 0 : i32
    %2 = arith.cmpi ne, %1, %c0_i32_0 : i32
    scf.if %2 {
      %cst = arith.constant 0.000000e+00 : f32
      %20 = vector.broadcast %cst : f32 to vector<8x128xf32>
      %c0_18 = arith.constant 0 : index
      %c0_19 = arith.constant 0 : index
      %21 = vector.load %arg7[%c0_18, %c0_19] : memref<8x128xf32, #tpu.memory_space<vmem>>, vector<8x128xf32>
      tpu.vector_store %arg7[%c0_18, %c0_19], %20 {strides = array<i32>} : memref<8x128xf32, #tpu.memory_space<vmem>>, vector<8x128xf32>,
      %cst_20 = arith.constant 0.000000e+00 : f32
      %22 = vector.broadcast %cst_20 : f32 to vector<8x128xf32>
      %c0_21 = arith.constant 0 : index
      %c0_22 = arith.constant 0 : index
      %23 = vector.load %arg8[%c0_21, %c0_22] : memref<8x128xf32, #tpu.memory_space<vmem>>, vector<8x128xf32>
      tpu.vector_store %arg8[%c0_21, %c0_22], %22 {strides = array<i32>} : memref<8x128xf32, #tpu.memory_space<vmem>>, vector<8x128xf32>,
    } else {
    }
    %c8_i32 = arith.constant 8 : i32
    %3 = arith.muli %arg1, %c8_i32 : i32
    %c0 = arith.constant 0 : index
    %4 = memref.load %arg2[%c0] : memref<1xi32, #tpu.memory_space<smem>>
    %5 = arith.subi %4, %3 : i32
    %c0_i32_1 = arith.constant 0 : i32
    %c8_i32_2 = arith.constant 8 : i32
    %6 = arith.maxsi %c0_i32_1, %5 : i32
    %7 = arith.minsi %c8_i32_2, %6 : i32
    %c0_3 = arith.constant 0 : index
    %c0_4 = arith.constant 0 : index
    %8 = vector.load %arg3[%c0_3, %c0_4] : memref<8x1xi32, #tpu.memory_space<vmem>>, vector<8x1xi32>
    %c0_5 = arith.constant 0 : index
    %c0_6 = arith.constant 0 : index
    %9 = vector.load %arg5[%c0_5, %c0_6] : memref<256x512xf32, #tpu.memory_space<vmem>>, vector<256x512xf32>
    %c0_7 = arith.constant 0 : index
    %c0_8 = arith.constant 0 : index
    %10 = vector.load %arg6[%c0_7, %c0_8] : memref<1x512xf32, #tpu.memory_space<vmem>>, vector<1x512xf32>
    %11 = vector.shape_cast %10 : vector<1x512xf32> to vector<1x512xf32>
    %12 = vector.broadcast %11 : vector<1x512xf32> to vector<8x512xf32>
    %c0_9 = arith.constant 0 : index
    %c0_10 = arith.constant 0 : index
    %13 = vector.load %arg7[%c0_9, %c0_10] : memref<8x128xf32, #tpu.memory_space<vmem>>, vector<8x128xf32>
    %c0_11 = arith.constant 0 : index
    %c0_12 = arith.constant 0 : index
    %14 = vector.load %arg8[%c0_11, %c0_12] : memref<8x128xf32, #tpu.memory_space<vmem>>, vector<8x128xf32>
    %c0_i32_13 = arith.constant 0 : i32
    %15 = arith.subi %7, %c0_i32_13 : i32
    %16 = arith.addi %c0_i32_13, %15 : i32
    %c1_i32 = arith.constant 1 : i32
    %17:2 = scf.for %arg9 = %c0_i32_13 to %16 step %c1_i32 iter_args(%arg10 = %13, %arg11 = %14) -> (vector<8x128xf32>, vector<8x128xf32>)  : i32 {
      %20 = arith.index_cast %arg9 : i32 to index
      %c0_18 = arith.constant 0 : index
      %c0_19 = arith.constant 0 : index
      %21 = vector.load %arg4[%20, %c0_18, %c0_19] : memref<8x8x128xf32, #tpu.memory_space<vmem>>, vector<1x8x128xf32>
      %22 = vector.shape_cast %21 : vector<1x8x128xf32> to vector<8x128xf32>
      %23 = tpu.concatenate %22, %arg10 in 1 : vector<8x128xf32>, vector<8x128xf32> -> vector<8x256xf32>
      %cst = arith.constant dense<0.000000e+00> : vector<8x512xf32>
      %24 = tpu.matmul %23, %9, %cst {dimension_numbers = #tpu.dot_dimension_numbers<[1], [0], [0], [1], [0, 0, 1, 1], [], []>} : vector<8x256xf32>, vector<256x512xf32>, vector<8x512xf32> -> vector<8x512xf32>
      %25 = arith.addf %24, %12 : vector<8x512xf32>
      %26 = vector.extract_strided_slice %25 {offsets = [0, 0], sizes = [8, 128], strides = [1, 1]} : vector<8x512xf32> to vector<8x128xf32>
      %27 = arith.negf %26 : vector<8x128xf32>
      %28 = math.exp %27 : vector<8x128xf32>
      %cst_20 = arith.constant 1.000000e+00 : f32
      %29 = vector.broadcast %cst_20 : f32 to vector<8x128xf32>
      %30 = arith.addf %29, %28 : vector<8x128xf32>
      %31 = arith.divf %29, %30 : vector<8x128xf32>
      %32 = vector.extract_strided_slice %25 {offsets = [0, 128], sizes = [8, 128], strides = [1, 1]} : vector<8x512xf32> to vector<8x128xf32>
      %33 = arith.negf %32 : vector<8x128xf32>
      %34 = math.exp %33 : vector<8x128xf32>
      %cst_21 = arith.constant 1.000000e+00 : f32
      %35 = vector.broadcast %cst_21 : f32 to vector<8x128xf32>
      %36 = arith.addf %35, %34 : vector<8x128xf32>
      %37 = arith.divf %35, %36 : vector<8x128xf32>
      %38 = vector.extract_strided_slice %25 {offsets = [0, 256], sizes = [8, 128], strides = [1, 1]} : vector<8x512xf32> to vector<8x128xf32>
      %39 = math.tanh %38 : vector<8x128xf32>
      %40 = vector.extract_strided_slice %25 {offsets = [0, 384], sizes = [8, 128], strides = [1, 1]} : vector<8x512xf32> to vector<8x128xf32>
      %41 = arith.negf %40 : vector<8x128xf32>
      %42 = math.exp %41 : vector<8x128xf32>
      %cst_22 = arith.constant 1.000000e+00 : f32
      %43 = vector.broadcast %cst_22 : f32 to vector<8x128xf32>
      %44 = arith.addf %43, %42 : vector<8x128xf32>
      %45 = arith.divf %43, %44 : vector<8x128xf32>
      %46 = arith.mulf %37, %arg11 : vector<8x128xf32>
      %47 = arith.mulf %31, %39 : vector<8x128xf32>
      %48 = arith.addf %46, %47 : vector<8x128xf32>
      %49 = math.tanh %48 : vector<8x128xf32>
      %50 = arith.mulf %45, %49 : vector<8x128xf32>
      %51 = arith.addi %3, %arg9 : i32
      %52 = vector.broadcast %51 : i32 to vector<8x1xi32>
      %53 = arith.cmpi slt, %52, %8 : vector<8x1xi32>
      %54 = vector.shape_cast %53 : vector<8x1xi1> to vector<8x1xi1>
      %55 = vector.broadcast %54 : vector<8x1xi1> to vector<8x128xi1>
      %56 = arith.select %55, %50, %arg10 : vector<8x128xi1>, vector<8x128xf32>
      %57 = vector.shape_cast %53 : vector<8x1xi1> to vector<8x1xi1>
      %58 = vector.broadcast %57 : vector<8x1xi1> to vector<8x128xi1>
      %59 = arith.select %58, %48, %arg11 : vector<8x128xi1>, vector<8x128xf32>
      scf.yield %56, %59 : vector<8x128xf32>, vector<8x128xf32>
    }
    %c0_14 = arith.constant 0 : index
    %c0_15 = arith.constant 0 : index
    %18 = vector.load %arg7[%c0_14, %c0_15] : memref<8x128xf32, #tpu.memory_space<vmem>>, vector<8x128xf32>
    tpu.vector_store %arg7[%c0_14, %c0_15], %17#0 {strides = array<i32>} : memref<8x128xf32, #tpu.memory_space<vmem>>, vector<8x128xf32>,
    %c0_16 = arith.constant 0 : index
    %c0_17 = arith.constant 0 : index
    %19 = vector.load %arg8[%c0_16, %c0_17] : memref<8x128xf32, #tpu.memory_space<vmem>>, vector<8x128xf32>
    tpu.vector_store %arg8[%c0_16, %c0_17], %17#1 {strides = array<i32>} : memref<8x128xf32, #tpu.memory_space<vmem>>, vector<8x128xf32>,
    return
  }
  func.func @transform_0(%arg0: i32, %arg1: i32, %arg2: memref<1xi32, #tpu.memory_space<smem>>) -> (i32, i32) {
    %c0_i32 = arith.constant 0 : i32
    %c0_i32_0 = arith.constant 0 : i32
    return %arg0, %c0_i32 : i32, i32
  }
  func.func @transform_1(%arg0: i32, %arg1: i32, %arg2: memref<1xi32, #tpu.memory_space<smem>>) -> (i32, i32, i32) {
    %c0_i32 = arith.constant 0 : i32
    %c0_i32_0 = arith.constant 0 : i32
    return %arg1, %arg0, %c0_i32 : i32, i32, i32
  }
  func.func @transform_2(%arg0: i32, %arg1: i32, %arg2: memref<1xi32, #tpu.memory_space<smem>>) -> (i32, i32) {
    %c0_i32 = arith.constant 0 : i32
    %c0_i32_0 = arith.constant 0 : i32
    %c0_i32_1 = arith.constant 0 : i32
    return %c0_i32, %c0_i32_0 : i32, i32
  }
  func.func @transform_3(%arg0: i32, %arg1: i32, %arg2: memref<1xi32, #tpu.memory_space<smem>>) -> (i32, i32) {
    %c0_i32 = arith.constant 0 : i32
    %c0_i32_0 = arith.constant 0 : i32
    %c0_i32_1 = arith.constant 0 : i32
    return %c0_i32, %c0_i32_0 : i32, i32
  }
  func.func @transform_4(%arg0: i32, %arg1: i32, %arg2: memref<1xi32, #tpu.memory_space<smem>>) -> (i32, i32) {
    %c0_i32 = arith.constant 0 : i32
    %c0_i32_0 = arith.constant 0 : i32
    return %arg0, %c0_i32 : i32, i32
  }
}

</mosaic_0001>

<bundles_post_ra>
// kernel: tpu_custom_call.1
= control target key start
LH: loop header
LB: loop body
LE: loop exit
PB: predicated region body
PF: predicated region fallthrough
CT: control target
= control target key end

     0   :  { %11 = vsyncpa [#allocation6], 0  ;;  %s1188_s0 = inlined_call_operand.<no memory space> [shape: s32[1], index: 0, kind: input, shape index: {}]   ;;  %s1189_s1 = inlined_call_operand.vmem [shape: s32[8,1], index: 1, kind: input, shape index: {}]   ;;  %s1190_s2 = inlined_call_operand.hbm [shape: f32[8,8,128], index: 2, kind: input, shape index: {}]   ;;  %s1191_s3 = inlined_call_operand.hbm [shape: f32[256,512], index: 3, kind: input, shape index: {}]   ;;  %s1192_s4 = inlined_call_operand.vmem [shape: f32[1,512], index: 4, kind: input, shape index: {}]   ;;  %s1193_s5 = inlined_call_operand.hbm [shape: f32[8,128], index: 5, kind: output, shape index: {}]  }
   0x1   :  { %12 = vsyncpa [#allocation9], 0 }
   0x2   :  { %13 = vsyncpa [#allocation7], 0  ;;  %s20_s20 = sshll.u32 %s1190_s2, 4  ;;  %s675_s21 = smov [#allocation5]   ;;  %s21_s20 = int_to_ptr.hbm [resolvable:$true] %s20_s20 }
   0x3   :  { %s22_s22 = sshll.u32 %s675_s21, 4  ;;  %s33_s25 = sshll.u32 %s1191_s3, 4  ;;  %s23_s22 = int_to_ptr.vmem [resolvable:$true] %s22_s22  ;;  %s34_s25 = int_to_ptr.hbm [resolvable:$true] %s33_s25 }
   0x4   :  { %s676_s26 = smov 128   ;;  %s677_s27 = smov 8  }
   0x5   :  { %28 = dma.hbm_to_vmem [thread:$0]  %s21_s20, 1024, %s23_s22, [#allocation6], %s676_s26, %s676_s26, %s677_s27  }
   0x6   :  { %s678_s28 = smov [#allocation8]   ;;  %s679_s30 = smov 512  }
   0x7   :  { %s35_s29 = sshll.u32 %s678_s28, 4  ;;  %s680_s6 = smov 32   ;;  %s36_s29 = int_to_ptr.vmem [resolvable:$true] %s35_s29 }
   0x8   :  { %41 = dma.hbm_to_vmem [thread:$0]  %s34_s25, 16384, %s36_s29, [#allocation9], %s679_s30, %s679_s30, %s680_s6  }
   0x9   :  { %653 = dma.done.wait [#allocation6], 1024  }
   0xa   :  { %654 = vsyncadd [#allocation6], 4294966272 }
   0xb   :  { %655 = dma.done.wait [#allocation9], 16384  }
   0xc   :  { %656 = vsyncadd [#allocation9], 4294950912  ;;  %p61_p0 = scmp.gt.s32.totalorder %s1188_s0, 0  ;;  %p483_p1 = scmp.lt.s32.totalorder %s1188_s0, 8  ;;  %v734_v0 = vld [vmem:[%s1189_s1] sm:$0xff]  ;;  %v738_v2 = vld [vmem:[#allocation8 + $0x8] sm:$0xff] }
   0xd   :  { %1194 = vst [vmem:[#allocation14_spill] sm:$0xff] %v734_v0  ;;  %v736_v1 = vld [vmem:[#allocation8] sm:$0xff]  ;;  %v740_v3 = vld [vmem:[#allocation8 + $0x10] sm:$0xff]  ;;  %v742_v4 = vld [vmem:[#allocation8 + $0x18] sm:$0xff]  ;;  %v681_v39 = vmov 0.0  }
   0xe   :  { %s1387_s0 = smov (!%p61_p0, %s1188_s0), 0  ;;  %1195 = vst [vmem:[#allocation15_spill] sm:$0xff] %v736_v1  ;;  %v744_v5 = vld [vmem:[#allocation8 + $0x20] sm:$0xff]  ;;  %v746_v6 = vld [vmem:[#allocation8 + $0x28] sm:$0xff]  ;;  %v748_v7 = vld [vmem:[#allocation8 + $0x30] sm:$0xff] }
   0xf   :  { %s1389_s0 = smov (!%p483_p1, %s1387_s0), 8  ;;  %1196 = vst [vmem:[#allocation16_spill] sm:$0xff] %v738_v2  ;;  %v750_v8 = vld [vmem:[#allocation8 + $0x38] sm:$0xff]  ;;  %v752_v9 = vld [vmem:[#allocation8 + $0x40] sm:$0xff]  ;;  %v754_v10 = vld [vmem:[#allocation8 + $0x48] sm:$0xff] }
  0x10   :  { %1197 = vst [vmem:[#allocation17_spill] sm:$0xff] %v740_v3  ;;  %v756_v11 = vld [vmem:[#allocation8 + $0x50] sm:$0xff]  ;;  %v758_v12 = vld [vmem:[#allocation8 + $0x58] sm:$0xff]  ;;  %v760_v13 = vld [vmem:[#allocation8 + $0x60] sm:$0xff]  ;;  %p488_p2 = scmp.le.s32.totalorder %s1389_s0, 0 }
  0x11   :  { %1198 = vst [vmem:[#allocation18_spill] sm:$0xff] %v742_v4  ;;  %v762_v14 = vld [vmem:[#allocation8 + $0x68] sm:$0xff]  ;;  %v764_v15 = vld [vmem:[#allocation8 + $0x70] sm:$0xff]  ;;  %v766_v16 = vld [vmem:[#allocation8 + $0x78] sm:$0xff]  ;;  %s1008_s14 = smov (!%p488_p2), 0  }
  0x12   :  { %1199 = vst [vmem:[#allocation19_spill] sm:$0xff] %v744_v5  ;;  %v768_v17 = vld [vmem:[#allocation8 + $0x80] sm:$0xff]  ;;  %v770_v18 = vld [vmem:[#allocation8 + $0x88] sm:$0xff]  ;;  %v772_v19 = vld [vmem:[#allocation8 + $0x90] sm:$0xff] }
  0x13   :  { %1200 = vst [vmem:[#allocation20_spill] sm:$0xff] %v746_v6  ;;  %v774_v20 = vld [vmem:[#allocation8 + $0x98] sm:$0xff]  ;;  %v776_v21 = vld [vmem:[#allocation8 + $0xa0] sm:$0xff]  ;;  %v778_v22 = vld [vmem:[#allocation8 + $0xa8] sm:$0xff]  ;;  %v1002_v6 = vmov 0.0  }
  0x14   :  { %1201 = vst [vmem:[#allocation21_spill] sm:$0xff] %v748_v7  ;;  %v780_v23 = vld [vmem:[#allocation8 + $0xb0] sm:$0xff]  ;;  %v782_v24 = vld [vmem:[#allocation8 + $0xb8] sm:$0xff]  ;;  %v784_v25 = vld [vmem:[#allocation8 + $0xc0] sm:$0xff] }
  0x15   :  { %1202 = vst [vmem:[#allocation22_spill] sm:$0xff] %v750_v8  ;;  %v786_v26 = vld [vmem:[#allocation8 + $0xc8] sm:$0xff]  ;;  %v788_v27 = vld [vmem:[#allocation8 + $0xd0] sm:$0xff]  ;;  %v790_v28 = vld [vmem:[#allocation8 + $0xd8] sm:$0xff] }
  0x16   :  { %1203 = vst [vmem:[#allocation23_spill] sm:$0xff] %v752_v9  ;;  %v792_v29 = vld [vmem:[#allocation8 + $0xe0] sm:$0xff]  ;;  %v794_v30 = vld [vmem:[#allocation8 + $0xe8] sm:$0xff]  ;;  %v796_v31 = vld [vmem:[#allocation8 + $0xf0] sm:$0xff] }
  0x17   :  { %1204 = vst [vmem:[#allocation24_spill] sm:$0xff] %v754_v10  ;;  %v798_v32 = vld [vmem:[#allocation8 + $0xf8] sm:$0xff]  ;;  %v800_v33 = vld [vmem:[#allocation8 + $0x100] sm:$0xff]  ;;  %v802_v34 = vld [vmem:[#allocation8 + $0x108] sm:$0xff] }
  0x18   :  { %1205 = vst [vmem:[#allocation25_spill] sm:$0xff] %v756_v11  ;;  %v804_v35 = vld [vmem:[#allocation8 + $0x110] sm:$0xff]  ;;  %v806_v36 = vld [vmem:[#allocation8 + $0x118] sm:$0xff]  ;;  %v808_v37 = vld [vmem:[#allocation8 + $0x120] sm:$0xff] }
  0x19   :  { %1206 = vst [vmem:[#allocation26_spill] sm:$0xff] %v758_v12  ;;  %v810_v38 = vld [vmem:[#allocation8 + $0x128] sm:$0xff]  ;;  %v812_v40 = vld [vmem:[#allocation8 + $0x130] sm:$0xff]  ;;  %v814_v41 = vld [vmem:[#allocation8 + $0x138] sm:$0xff] }
  0x1a   :  { %1207 = vst [vmem:[#allocation27_spill] sm:$0xff] %v760_v13  ;;  %v816_v42 = vld [vmem:[#allocation8 + $0x140] sm:$0xff]  ;;  %v818_v43 = vld [vmem:[#allocation8 + $0x148] sm:$0xff]  ;;  %v820_v44 = vld [vmem:[#allocation8 + $0x150] sm:$0xff] }
  0x1b   :  { %1208 = vst [vmem:[#allocation28_spill] sm:$0xff] %v762_v14  ;;  %v822_v45 = vld [vmem:[#allocation8 + $0x158] sm:$0xff]  ;;  %v824_v46 = vld [vmem:[#allocation8 + $0x160] sm:$0xff]  ;;  %v826_v47 = vld [vmem:[#allocation8 + $0x168] sm:$0xff] }
  0x1c   :  { %1209 = vst [vmem:[#allocation29_spill] sm:$0xff] %v764_v15  ;;  %v828_v48 = vld [vmem:[#allocation8 + $0x170] sm:$0xff]  ;;  %v830_v49 = vld [vmem:[#allocation8 + $0x178] sm:$0xff]  ;;  %v832_v50 = vld [vmem:[#allocation8 + $0x180] sm:$0xff] }
  0x1d   :  { %1210 = vst [vmem:[#allocation30_spill] sm:$0xff] %v766_v16  ;;  %v834_v51 = vld [vmem:[#allocation8 + $0x188] sm:$0xff]  ;;  %v836_v52 = vld [vmem:[#allocation8 + $0x190] sm:$0xff]  ;;  %v838_v53 = vld [vmem:[#allocation8 + $0x198] sm:$0xff] }
  0x1e   :  { %1211 = vst [vmem:[#allocation31_spill] sm:$0xff] %v768_v17  ;;  %v840_v54 = vld [vmem:[#allocation8 + $0x1a0] sm:$0xff]  ;;  %v842_v55 = vld [vmem:[#allocation8 + $0x1a8] sm:$0xff]  ;;  %v844_v56 = vld [vmem:[#allocation8 + $0x1b0] sm:$0xff] }
  0x1f   :  { %1212 = vst [vmem:[#allocation32_spill] sm:$0xff] %v770_v18  ;;  %v846_v57 = vld [vmem:[#allocation8 + $0x1b8] sm:$0xff]  ;;  %v848_v58 = vld [vmem:[#allocation8 + $0x1c0] sm:$0xff]  ;;  %v850_v59 = vld [vmem:[#allocation8 + $0x1c8] sm:$0xff] }
  0x20   :  { %1213 = vst [vmem:[#allocation33_spill] sm:$0xff] %v772_v19  ;;  %v852_v60 = vld [vmem:[#allocation8 + $0x1d0] sm:$0xff]  ;;  %v854_v61 = vld [vmem:[#allocation8 + $0x1d8] sm:$0xff]  ;;  %v856_v62 = vld [vmem:[#allocation8 + $0x1e0] sm:$0xff] }
  0x21   :  { %1214 = vst [vmem:[#allocation34_spill] sm:$0xff] %v774_v20  ;;  %v858_v63 = vld [vmem:[#allocation8 + $0x1e8] sm:$0xff]  ;;  %v862_v3 = vld [vmem:[#allocation8 + $0x1f8] sm:$0xff]  ;;  %v864_v7 = vld [vmem:[#allocation8 + $0x200] sm:$0xff] }
  0x22   :  { %1215 = vst [vmem:[#allocation35_spill] sm:$0xff] %v776_v21  ;;  %v866_v0 = vld [vmem:[#allocation8 + $0x208] sm:$0xff]  ;;  %v868_v4 = vld [vmem:[#allocation8 + $0x210] sm:$0xff]  ;;  %v870_v11 = vld [vmem:[#allocation8 + $0x218] sm:$0xff] }
  0x23   :  { %1216 = vst [vmem:[#allocation36_spill] sm:$0xff] %v778_v22  ;;  %v872_v8 = vld [vmem:[#allocation8 + $0x220] sm:$0xff]  ;;  %v874_v15 = vld [vmem:[#allocation8 + $0x228] sm:$0xff]  ;;  %v876_v12 = vld [vmem:[#allocation8 + $0x230] sm:$0xff] }
  0x24   :  { %1217 = vst [vmem:[#allocation37_spill] sm:$0xff] %v780_v23  ;;  %v878_v19 = vld [vmem:[#allocation8 + $0x238] sm:$0xff]  ;;  %v880_v16 = vld [vmem:[#allocation8 + $0x240] sm:$0xff]  ;;  %v882_v23 = vld [vmem:[#allocation8 + $0x248] sm:$0xff] }
  0x25   :  { %1218 = vst [vmem:[#allocation38_spill] sm:$0xff] %v782_v24  ;;  %v884_v20 = vld [vmem:[#allocation8 + $0x250] sm:$0xff]  ;;  %v888_v24 = vld [vmem:[#allocation8 + $0x260] sm:$0xff]  ;;  %v982_v2 = vld [vmem:[#allocation8 + $0x3d8] sm:$0xff] }
  0x26   :  { %1219 = vst [vmem:[#allocation39_spill] sm:$0xff] %v784_v25  ;;  %v968_v1 = vld [vmem:[#allocation8 + $0x3a0] sm:$0xff]  ;;  %v990_v5 = vld [vmem:[#allocation8 + $0x3f8] sm:$0xff] }
  0x27   :  { %1220 = vst [vmem:[#allocation40_spill] sm:$0xff] %v788_v27  ;;  %v886_v27 = vld [vmem:[#allocation8 + $0x258] sm:$0xff] }
  0x28   :  { %1221 = vst [vmem:[#allocation41_spill] sm:$0xff] %v790_v28  ;;  %v896_v28 = vld [vmem:[#allocation8 + $0x280] sm:$0xff] }
  0x29   :  { %1222 = vst [vmem:[#allocation42_spill] sm:$0xff] %v796_v31  ;;  %v894_v31 = vld [vmem:[#allocation8 + $0x278] sm:$0xff] }
  0x2a   :  { %1223 = vst [vmem:[#allocation43_spill] sm:$0xff] %v798_v32  ;;  %v904_v32 = vld [vmem:[#allocation8 + $0x2a0] sm:$0xff] }
  0x2b   :  { %1224 = vst [vmem:[#allocation44_spill] sm:$0xff] %v804_v35  ;;  %v902_v35 = vld [vmem:[#allocation8 + $0x298] sm:$0xff] }
  0x2c   :  { %1225 = vst [vmem:[#allocation45_spill] sm:$0xff] %v806_v36  ;;  %v912_v36 = vld [vmem:[#allocation8 + $0x2c0] sm:$0xff] }
  0x2d   :  { %56 = vst [vmem:[#allocation10] sm:$0xff] %v681_v39  ;;  %v860_v39 = vld [vmem:[#allocation8 + $0x1f0] sm:$0xff] }
  0x2e   :  { %1226 = vst [vmem:[#allocation46_spill] sm:$0xff] %v812_v40  ;;  %v910_v40 = vld [vmem:[#allocation8 + $0x2b8] sm:$0xff] }
  0x2f   :  { %1227 = vst [vmem:[#allocation47_spill] sm:$0xff] %v814_v41  ;;  %v920_v41 = vld [vmem:[#allocation8 + $0x2e0] sm:$0xff] }
  0x30   :  { %1228 = vst [vmem:[#allocation48_spill] sm:$0xff] %v820_v44  ;;  %v918_v44 = vld [vmem:[#allocation8 + $0x2d8] sm:$0xff] }
  0x31   :  { %1229 = vst [vmem:[#allocation49_spill] sm:$0xff] %v822_v45  ;;  %v928_v45 = vld [vmem:[#allocation8 + $0x300] sm:$0xff] }
  0x32   :  { %1230 = vst [vmem:[#allocation50_spill] sm:$0xff] %v828_v48  ;;  %v926_v48 = vld [vmem:[#allocation8 + $0x2f8] sm:$0xff] }
  0x33   :  { %1231 = vst [vmem:[#allocation51_spill] sm:$0xff] %v830_v49  ;;  %v936_v49 = vld [vmem:[#allocation8 + $0x320] sm:$0xff] }
  0x34   :  { %1232 = vst [vmem:[#allocation52_spill] sm:$0xff] %v836_v52  ;;  %v934_v52 = vld [vmem:[#allocation8 + $0x318] sm:$0xff] }
  0x35   :  { %1233 = vst [vmem:[#allocation53_spill] sm:$0xff] %v838_v53  ;;  %v944_v53 = vld [vmem:[#allocation8 + $0x340] sm:$0xff] }
  0x36   :  { %1234 = vst [vmem:[#allocation54_spill] sm:$0xff] %v844_v56  ;;  %v942_v56 = vld [vmem:[#allocation8 + $0x338] sm:$0xff] }
  0x37   :  { %1235 = vst [vmem:[#allocation55_spill] sm:$0xff] %v846_v57  ;;  %v950_v57 = vld [vmem:[#allocation8 + $0x358] sm:$0xff] }
  0x38   :  { %1236 = vst [vmem:[#allocation56_spill] sm:$0xff] %v852_v60  ;;  %v952_v60 = vld [vmem:[#allocation8 + $0x360] sm:$0xff] }
  0x39   :  { %1237 = vst [vmem:[#allocation57_spill] sm:$0xff] %v854_v61  ;;  %v960_v61 = vld [vmem:[#allocation8 + $0x380] sm:$0xff] }
  0x3a   :  { %1238 = vst [vmem:[#allocation58_spill] sm:$0xff] %v860_v39  ;;  %v966_v39 = vld [vmem:[#allocation8 + $0x398] sm:$0xff] }
  0x3b   :  { %1239 = vst [vmem:[#allocation59_spill] sm:$0xff] %v862_v3  ;;  %v974_v3 = vld [vmem:[#allocation8 + $0x3b8] sm:$0xff] }
  0x3c   :  { %1240 = vst [vmem:[#allocation60_spill] sm:$0xff] %v864_v7  ;;  %v958_v7 = vld [vmem:[#allocation8 + $0x378] sm:$0xff] }
  0x3d   :  { %1241 = vst [vmem:[#allocation61_spill] sm:$0xff] %v866_v0  ;;  %v976_v0 = vld [vmem:[#allocation8 + $0x3c0] sm:$0xff] }
  0x3e   :  { %1242 = vst [vmem:[#allocation62_spill] sm:$0xff] %v868_v4  ;;  %v890_v4 = vld [vmem:[#allocation8 + $0x268] sm:$0xff] }
  0x3f   :  { %1243 = vst [vmem:[#allocation63_spill] sm:$0xff] %v870_v11  ;;  %v892_v11 = vld [vmem:[#allocation8 + $0x270] sm:$0xff] }
  0x40   :  { %1244 = vst [vmem:[#allocation64_spill] sm:$0xff] %v872_v8  ;;  %v984_v8 = vld [vmem:[#allocation8 + $0x3e0] sm:$0xff] }
  0x41   :  { %1245 = vst [vmem:[#allocation65_spill] sm:$0xff] %v874_v15 }
  0x42   :  { %1246 = vst [vmem:[#allocation66_spill] sm:$0xff] %v876_v12  ;;  %v898_v12 = vld [vmem:[#allocation8 + $0x288] sm:$0xff] }
  0x43   :  { %1247 = vst [vmem:[#allocation67_spill] sm:$0xff] %v878_v19  ;;  %v900_v19 = vld [vmem:[#allocation8 + $0x290] sm:$0xff] }
  0x44   :  { %1248 = vst [vmem:[#allocation68_spill] sm:$0xff] %v880_v16 }
  0x45   :  { %1249 = vst [vmem:[#allocation69_spill] sm:$0xff] %v882_v23 }
  0x46   :  { %1250 = vst [vmem:[#allocation70_spill] sm:$0xff] %v884_v20  ;;  %v906_v20 = vld [vmem:[#allocation8 + $0x2a8] sm:$0xff] }
  0x47   :  { %1251 = vst [vmem:[#allocation71_spill] sm:$0xff] %v886_v27  ;;  %v908_v27 = vld [vmem:[#allocation8 + $0x2b0] sm:$0xff] }
  0x48   :  { %1252 = vst [vmem:[#allocation72_spill] sm:$0xff] %v888_v24 }
  0x49   :  { %1253 = vst [vmem:[#allocation73_spill] sm:$0xff] %v890_v4 }
  0x4a   :  { %1254 = vst [vmem:[#allocation74_spill] sm:$0xff] %v892_v11  ;;  %v914_v11 = vld [vmem:[#allocation8 + $0x2c8] sm:$0xff] }
  0x4b   :  { %1255 = vst [vmem:[#allocation75_spill] sm:$0xff] %v894_v31  ;;  %v916_v31 = vld [vmem:[#allocation8 + $0x2d0] sm:$0xff] }
  0x4c   :  { %1256 = vst [vmem:[#allocation76_spill] sm:$0xff] %v898_v12 }
  0x4d   :  { %1257 = vst [vmem:[#allocation77_spill] sm:$0xff] %v900_v19  ;;  %v922_v19 = vld [vmem:[#allocation8 + $0x2e8] sm:$0xff] }
  0x4e   :  { %1258 = vst [vmem:[#allocation78_spill] sm:$0xff] %v902_v35  ;;  %v924_v35 = vld [vmem:[#allocation8 + $0x2f0] sm:$0xff] }
  0x4f   :  { %1259 = vst [vmem:[#allocation79_spill] sm:$0xff] %v906_v20 }
  0x50   :  { %1260 = vst [vmem:[#allocation80_spill] sm:$0xff] %v908_v27  ;;  %v930_v27 = vld [vmem:[#allocation8 + $0x308] sm:$0xff] }
  0x51   :  { %1261 = vst [vmem:[#allocation81_spill] sm:$0xff] %v910_v40  ;;  %v932_v40 = vld [vmem:[#allocation8 + $0x310] sm:$0xff] }
  0x52   :  { %1262 = vst [vmem:[#allocation82_spill] sm:$0xff] %v914_v11 }
  0x53   :  { %1263 = vst [vmem:[#allocation83_spill] sm:$0xff] %v916_v31  ;;  %v938_v31 = vld [vmem:[#allocation8 + $0x328] sm:$0xff] }
  0x54   :  { %1264 = vst [vmem:[#allocation84_spill] sm:$0xff] %v918_v44  ;;  %v940_v44 = vld [vmem:[#allocation8 + $0x330] sm:$0xff] }
  0x55   :  { %1265 = vst [vmem:[#allocation85_spill] sm:$0xff] %v922_v19 }
  0x56   :  { %1266 = vst [vmem:[#allocation86_spill] sm:$0xff] %v924_v35  ;;  %v946_v35 = vld [vmem:[#allocation8 + $0x348] sm:$0xff] }
  0x57   :  { %1267 = vst [vmem:[#allocation87_spill] sm:$0xff] %v926_v48  ;;  %v948_v48 = vld [vmem:[#allocation8 + $0x350] sm:$0xff] }
  0x58   :  { %1268 = vst [vmem:[#allocation88_spill] sm:$0xff] %v932_v40  ;;  %v954_v40 = vld [vmem:[#allocation8 + $0x368] sm:$0xff] }
  0x59   :  { %1269 = vst [vmem:[#allocation89_spill] sm:$0xff] %v934_v52  ;;  %v956_v52 = vld [vmem:[#allocation8 + $0x370] sm:$0xff] }
  0x5a   :  { %1270 = vst [vmem:[#allocation90_spill] sm:$0xff] %v940_v44  ;;  %v962_v44 = vld [vmem:[#allocation8 + $0x388] sm:$0xff] }
  0x5b   :  { %1271 = vst [vmem:[#allocation91_spill] sm:$0xff] %v942_v56  ;;  %v964_v56 = vld [vmem:[#allocation8 + $0x390] sm:$0xff] }
  0x5c   :  { %1272 = vst [vmem:[#allocation92_spill] sm:$0xff] %v948_v48  ;;  %v970_v48 = vld [vmem:[#allocation8 + $0x3a8] sm:$0xff] }
  0x5d   :  { %1273 = vst [vmem:[#allocation93_spill] sm:$0xff] %v950_v57  ;;  %v972_v57 = vld [vmem:[#allocation8 + $0x3b0] sm:$0xff] }
  0x5e   :  { %1274 = vst [vmem:[#allocation94_spill] sm:$0xff] %v956_v52  ;;  %v978_v52 = vld [vmem:[#allocation8 + $0x3c8] sm:$0xff] }
  0x5f   :  { %1275 = vst [vmem:[#allocation95_spill] sm:$0xff] %v958_v7  ;;  %v980_v7 = vld [vmem:[#allocation8 + $0x3d0] sm:$0xff] }
  0x60   :  { %1276 = vst [vmem:[#allocation96_spill] sm:$0xff] %v964_v56  ;;  %v986_v56 = vld [vmem:[#allocation8 + $0x3e8] sm:$0xff] }
  0x61   :  { %1277 = vst [vmem:[#allocation97_spill] sm:$0xff] %v966_v39  ;;  %v988_v39 = vld [vmem:[#allocation8 + $0x3f0] sm:$0xff] }
  0x62   :  { %1278 = vst [vmem:[#allocation98_spill] sm:$0xff] %v968_v1 }
  0x63   :  { %1279 = vst [vmem:[#allocation99_spill] sm:$0xff] %v972_v57  ;;  %v995_v57 = vld [vmem:[%s1192_s4] sm:$0xf] }
  0x64   :  { %1280 = vst [vmem:[#allocation100_spill] sm:$0xff] %v974_v3 }
  0x65   :  { %1281 = vst [vmem:[#allocation101_spill] sm:$0xff] %v976_v0 }
  0x66   :  { %1282 = vst [vmem:[#allocation102_spill] sm:$0xff] %v980_v7  ;;  %476 = sbr.rel (%p488_p2) target bundleno = 341 (0x155), region = 50 }
  0x67   :  { %1283 = vst [vmem:[#allocation103_spill] sm:$0xff] %v982_v2 }
  0x68   :  { %1284 = vst [vmem:[#allocation104_spill] sm:$0xff] %v984_v8 }
  0x69   :  { %1285 = vst [vmem:[#allocation105_spill] sm:$0xff] %v988_v39 }
  0x6a   :  { %1286 = vst [vmem:[#allocation106_spill] sm:$0xff] %v990_v5 }
  0x6b   :  { %v1004_v39 = vmov 0.0   ;;  %v1006_v5 = vmov 0.0  }
  0x6c LB: > { %257 = vmatpush.msra.mxu2 %v858_v63  ;;  %277 = vmatpush.msra.mxu3 %v986_v56  ;;  %v1288_v0 = vld [vmem:[#allocation101_spill] sm:$0xff]  ;;  %v1289_v1 = vld [vmem:[#allocation98_spill] sm:$0xff]  ;;  %v1292_v25 = vld [vmem:[#allocation39_spill] sm:$0xff]  ;;  %s489_s4 = sshll.u32 %s669_s14, 3  ;;  %s669_s14 = sphi %s1008_s14, %s209_s14   ;;  %v665_v5 = vphi %v1006_v5, %v1384_v5   ;;  %v661_v39 = vphi %v1004_v39, %v449_v39  }
  0x6d   : > { %217 = vmatpush.msra.mxu0 %v856_v62  ;;  %v1290_v19 = vld [vmem:[#allocation85_spill] sm:$0xff]  ;;  %v1291_v11 = vld [vmem:[#allocation82_spill] sm:$0xff]  ;;  %v1293_v22 = vld [vmem:[#allocation36_spill] sm:$0xff]  ;;  %s215_s15 = scalar_lea.vmem [#allocation5], %s489_s4 }
  0x6e   : > { %258 = vmatpush.msra.mxu2 %v850_v59  ;;  %278 = vmatpush.msra.mxu3 %v978_v52  ;;  %v1294_v20 = vld [vmem:[#allocation79_spill] sm:$0xff]  ;;  %v1296_v18 = vld [vmem:[#allocation32_spill] sm:$0xff]  ;;  %v1300_v4 = vld [vmem:[#allocation73_spill] sm:$0xff] }
  0x6f   : > { %v1287_v8 = vld [vmem:[#allocation104_spill] sm:$0xff]  ;;  %218 = vmatpush.msra.mxu0 %v848_v58  ;;  %v1295_v21 = vld [vmem:[#allocation35_spill] sm:$0xff]  ;;  %v1304_v23 = vld [vmem:[#allocation69_spill] sm:$0xff] }
  0x70   : > { %237 = vmatpush.msra.mxu1 %v1287_v8  ;;  %259 = vmatpush.msra.mxu2 %v842_v55  ;;  %v1297_v12 = vld [vmem:[#allocation76_spill] sm:$0xff]  ;;  %v1298_v17 = vld [vmem:[#allocation31_spill] sm:$0xff]  ;;  %v1308_v2 = vld [vmem:[#allocation65_spill] sm:$0xff] }
  0x71   : > { %279 = vmatpush.msra.mxu3 %v970_v48  ;;  %219 = vmatpush.msra.mxu0 %v840_v54  ;;  %v1299_v14 = vld [vmem:[#allocation28_spill] sm:$0xff]  ;;  %v1301_v13 = vld [vmem:[#allocation27_spill] sm:$0xff]  ;;  %v1315_v8 = vld [vmem:[#allocation106_spill] sm:$0xff] }
  0x72   : > { %238 = vmatpush.msra.mxu1 %v1288_v0  ;;  %260 = vmatpush.msra.mxu2 %v834_v51  ;;  %v1302_v24 = vld [vmem:[#allocation72_spill] sm:$0xff]  ;;  %v1305_v9 = vld [vmem:[#allocation23_spill] sm:$0xff]  ;;  %v1312_v0 = vld [vmem:[#allocation61_spill] sm:$0xff] }
  0x73   : > { %280 = vmatpush.msra.mxu3 %v962_v44  ;;  %220 = vmatpush.msra.mxu0 %v832_v50  ;;  %v1303_v10 = vld [vmem:[#allocation24_spill] sm:$0xff]  ;;  %v1309_v7 = vld [vmem:[#allocation19_spill] sm:$0xff] }
  0x74   : > { %239 = vmatpush.msra.mxu1 %v1289_v1  ;;  %261 = vmatpush.msra.mxu2 %v826_v47  ;;  %v1306_v16 = vld [vmem:[#allocation68_spill] sm:$0xff]  ;;  %v1313_v1 = vld [vmem:[#allocation59_spill] sm:$0xff] }
  0x75   : > { %281 = vmatpush.msra.mxu3 %v954_v40  ;;  %221 = vmatpush.msra.mxu0 %v824_v46  ;;  %v1307_v6 = vld [vmem:[#allocation20_spill] sm:$0xff] }
  0x76   : > { %240 = vmatpush.msra.mxu1 %v960_v61  ;;  %262 = vmatpush.msra.mxu2 %v818_v43  ;;  %v1310_v3 = vld [vmem:[#allocation64_spill] sm:$0xff] }
  0x77   : > { %282 = vmatpush.msra.mxu3 %v946_v35  ;;  %222 = vmatpush.msra.mxu0 %v816_v42  ;;  %v1311_v15 = vld [vmem:[#allocation16_spill] sm:$0xff] }
  0x78   : > { %241 = vmatpush.msra.mxu1 %v952_v60  ;;  %263 = vmatpush.msra.mxu2 %v810_v38 }
  0x79   : > { %283 = vmatpush.msra.mxu3 %v938_v31  ;;  %223 = vmatpush.msra.mxu0 %v808_v37 }
  0x7a   : > { %242 = vmatpush.msra.mxu1 %v944_v53  ;;  %264 = vmatpush.msra.mxu2 %v802_v34 }
  0x7b   : > { %284 = vmatpush.msra.mxu3 %v930_v27  ;;  %224 = vmatpush.msra.mxu0 %v800_v33 }
  0x7c   : > { %243 = vmatpush.msra.mxu1 %v936_v49  ;;  %265 = vmatpush.msra.mxu2 %v794_v30 }
  0x7d   : > { %285 = vmatpush.msra.mxu3 %v1290_v19  ;;  %225 = vmatpush.msra.mxu0 %v792_v29 }
  0x7e   : > { %244 = vmatpush.msra.mxu1 %v928_v45  ;;  %266 = vmatpush.msra.mxu2 %v786_v26 }
  0x7f   : > { %286 = vmatpush.msra.mxu3 %v1291_v11  ;;  %226 = vmatpush.msra.mxu0 %v1292_v25  ;;  %v1351_v11 = vld [vmem:[#allocation38_spill] sm:$0xff] }
  0x80   : > { %245 = vmatpush.msra.mxu1 %v920_v41  ;;  %267 = vmatpush.msra.mxu2 %v1293_v22 }
  0x81   : > { %287 = vmatpush.msra.mxu3 %v1294_v20  ;;  %227 = vmatpush.msra.mxu0 %v1295_v21  ;;  %v1383_v21 = vperm.slane %v995_v57, 3 }
  0x82   : > { %246 = vmatpush.msra.mxu1 %v912_v36  ;;  %268 = vmatpush.msra.mxu2 %v1296_v18 }
  0x83   : > { %288 = vmatpush.msra.mxu3 %v1297_v12  ;;  %228 = vmatpush.msra.mxu0 %v1298_v17 }
  0x84   : > { %247 = vmatpush.msra.mxu1 %v904_v32  ;;  %269 = vmatpush.msra.mxu2 %v1299_v14 }
  0x85   : > { %289 = vmatpush.msra.mxu3 %v1300_v4  ;;  %229 = vmatpush.msra.mxu0 %v1301_v13  ;;  %v1314_v4 = vld [vmem:[#allocation15_spill] sm:$0xff] }
  0x86   : > { %248 = vmatpush.msra.mxu1 %v896_v28  ;;  %270 = vmatpush.msra.mxu2 %v1303_v10  ;;  %v1317_v10 = vld [vmem:[#allocation57_spill] sm:$0xff] }
  0x87   : > { %290 = vmatpush.msra.mxu3 %v1304_v23  ;;  %230 = vmatpush.msra.mxu0 %v1305_v9  ;;  %v1316_v9 = vld [vmem:[#allocation58_spill] sm:$0xff] }
  0x88   : > { %249 = vmatpush.msra.mxu1 %v1302_v24  ;;  %271 = vmatpush.msra.mxu2 %v1307_v6  ;;  %v1318_v6 = vld [vmem:[#allocation60_spill] sm:$0xff] }
  0x89   : > { %291 = vmatpush.msra.mxu3 %v1308_v2  ;;  %231 = vmatpush.msra.mxu0 %v1309_v7  ;;  %v1088_v2 = vld [vmem:[%s215_s15] sm:$0xff]  ;;  %v1320_v7 = vld [vmem:[#allocation56_spill] sm:$0xff] }
  0x8a   : > { %250 = vmatpush.msra.mxu1 %v1306_v16  ;;  %272 = vmatpush.msra.mxu2 %v1311_v15  ;;  %v1327_v15 = vld [vmem:[#allocation97_spill] sm:$0xff] }
  0x8b   : > { %292 = vmatpush.msra.mxu3 %v1312_v0  ;;  %232 = vmatpush.msra.mxu0 %v1314_v4  ;;  %v1321_v0 = vld [vmem:[#allocation55_spill] sm:$0xff]  ;;  %v1323_v4 = vld [vmem:[#allocation100_spill] sm:$0xff] }
  0x8c   : > { %251 = vmatpush.msra.mxu1 %v1310_v3  ;;  %337 = vmatpush.msrb.mxu2 %v1313_v1  ;;  %v1319_v3 = vld [vmem:[#allocation103_spill] sm:$0xff]  ;;  %v1322_v1 = vld [vmem:[#allocation105_spill] sm:$0xff] }
  0x8d   : > { %357 = vmatpush.msrb.mxu3 %v1315_v8  ;;  %297 = vmatpush.msrb.mxu0 %v1316_v9  ;;  %v1324_v8 = vld [vmem:[#allocation53_spill] sm:$0xff]  ;;  %v1325_v9 = vld [vmem:[#allocation54_spill] sm:$0xff] }
  0x8e   : > { %338 = vmatpush.msrb.mxu2 %v1317_v10  ;;  %252 = vmatpush.msra.mxu1 %v1318_v6  ;;  %v1326_v10 = vld [vmem:[#allocation102_spill] sm:$0xff]  ;;  %v1328_v6 = vld [vmem:[#allocation51_spill] sm:$0xff] }
  0x8f   : > { %358 = vmatpush.msrb.mxu3 %v1319_v3  ;;  %298 = vmatpush.msrb.mxu0 %v1320_v7  ;;  %v1329_v3 = vld [vmem:[#allocation52_spill] sm:$0xff]  ;;  %v1330_v7 = vld [vmem:[#allocation99_spill] sm:$0xff] }
  0x90   : > { %339 = vmatpush.msrb.mxu2 %v1321_v0  ;;  %317 = vmatpush.msrb.mxu1 %v1322_v1  ;;  %v1331_v0 = vld [vmem:[#allocation49_spill] sm:$0xff]  ;;  %v1332_v1 = vld [vmem:[#allocation95_spill] sm:$0xff] }
  0x91   : > { %359 = vmatpush.msrb.mxu3 %v1323_v4  ;;  %273 = vmatmul.f32.vlgmr.msra.gmra.mxu2 %v1088_v2  ;;  %v1333_v4 = vld [vmem:[#allocation50_spill] sm:$0xff] }
  0x92   : > { %340 = vmatpush.msrb.mxu2 %v1324_v8  ;;  %299 = vmatpush.msrb.mxu0 %v1325_v9  ;;  %v1334_v8 = vld [vmem:[#allocation96_spill] sm:$0xff]  ;;  %v1335_v9 = vld [vmem:[#allocation47_spill] sm:$0xff] }
  0x93   : > { %318 = vmatpush.msrb.mxu1 %v1326_v10  ;;  %360 = vmatpush.msrb.mxu3 %v1327_v15  ;;  %v1336_v10 = vld [vmem:[#allocation93_spill] sm:$0xff]  ;;  %v1337_v15 = vld [vmem:[#allocation94_spill] sm:$0xff] }
  0x94   : > { %341 = vmatpush.msrb.mxu2 %v1328_v6  ;;  %293 = vmatmul.f32.vlgmr.msra.gmra.mxu3 %v665_v5  ;;  %v1338_v6 = vld [vmem:[#allocation48_spill] sm:$0xff] }
  0x95   : > { %300 = vmatpush.msrb.mxu0 %v1329_v3  ;;  %319 = vmatpush.msrb.mxu1 %v1330_v7  ;;  %v1339_v3 = vld [vmem:[#allocation45_spill] sm:$0xff]  ;;  %v1340_v7 = vld [vmem:[#allocation91_spill] sm:$0xff] }
  0x96   : > { %342 = vmatpush.msrb.mxu2 %v1331_v0  ;;  %361 = vmatpush.msrb.mxu3 %v1332_v1  ;;  %v1341_v0 = vld [vmem:[#allocation46_spill] sm:$0xff]  ;;  %v1342_v1 = vld [vmem:[#allocation92_spill] sm:$0xff] }
  0x97   : > { %301 = vmatpush.msrb.mxu0 %v1333_v4  ;;  %320 = vmatpush.msrb.mxu1 %v1334_v8  ;;  %v1343_v4 = vld [vmem:[#allocation43_spill] sm:$0xff]  ;;  %v1344_v8 = vld [vmem:[#allocation89_spill] sm:$0xff] }
  0x98   : > { %343 = vmatpush.msrb.mxu2 %v1335_v9  ;;  %362 = vmatpush.msrb.mxu3 %v1336_v10  ;;  %v1345_v9 = vld [vmem:[#allocation44_spill] sm:$0xff]  ;;  %v1346_v10 = vld [vmem:[#allocation90_spill] sm:$0xff] }
  0x99   : > { %233 = vmatmul.f32.vlgmr.msra.gmra.mxu0 %v1088_v2  ;;  %321 = vmatpush.msrb.mxu1 %v1337_v15  ;;  %v1347_v15 = vld [vmem:[#allocation41_spill] sm:$0xff] }
  0x9a   : > { %302 = vmatpush.msrb.mxu0 %v1338_v6  ;;  %344 = vmatpush.msrb.mxu2 %v1339_v3  ;;  %v1348_v6 = vld [vmem:[#allocation87_spill] sm:$0xff]  ;;  %v1349_v3 = vld [vmem:[#allocation42_spill] sm:$0xff] }
  0x9b   : > { %363 = vmatpush.msrb.mxu3 %v1340_v7  ;;  %253 = vmatmul.f32.vlgmr.msra.gmra.mxu1 %v665_v5  ;;  %v1350_v7 = vld [vmem:[#allocation88_spill] sm:$0xff] }
  0x9c   : > { %303 = vmatpush.msrb.mxu0 %v1341_v0  ;;  %322 = vmatpush.msrb.mxu1 %v1342_v1  ;;  %v1352_v0 = vld [vmem:[#allocation84_spill] sm:$0xff] }
  0x9d   : > { %345 = vmatpush.msrb.mxu2 %v1343_v4  ;;  %364 = vmatpush.msrb.mxu3 %v1344_v8  ;;  %v1353_v1 = vld [vmem:[#allocation40_spill] sm:$0xff]  ;;  %v1354_v4 = vld [vmem:[#allocation86_spill] sm:$0xff] }
  0x9e   : > { %304 = vmatpush.msrb.mxu0 %v1345_v9  ;;  %323 = vmatpush.msrb.mxu1 %v1346_v10  ;;  %v1355_v8 = vld [vmem:[#allocation34_spill] sm:$0xff]  ;;  %v1356_v9 = vld [vmem:[#allocation81_spill] sm:$0xff] }
  0x9f   : > { %346 = vmatpush.msrb.mxu2 %v1347_v15  ;;  %365 = vmatpush.msrb.mxu3 %v1348_v6  ;;  %v1357_v10 = vld [vmem:[#allocation37_spill] sm:$0xff]  ;;  %v1358_v15 = vld [vmem:[#allocation83_spill] sm:$0xff]  ;;  %v1359_v6 = vld [vmem:[#allocation30_spill] sm:$0xff] }
  0xa0   : > { %305 = vmatpush.msrb.mxu0 %v1349_v3  ;;  %324 = vmatpush.msrb.mxu1 %v1350_v7  ;;  %v1360_v3 = vld [vmem:[#allocation78_spill] sm:$0xff]  ;;  %v1362_v7 = vld [vmem:[#allocation80_spill] sm:$0xff] }
  0xa1   : > { %347 = vmatpush.msrb.mxu2 %v1351_v11  ;;  %366 = vmatpush.msrb.mxu3 %v1352_v0  ;;  %v1361_v11 = vld [vmem:[#allocation33_spill] sm:$0xff]  ;;  %v1363_v0 = vld [vmem:[#allocation26_spill] sm:$0xff] }
  0xa2   : > { %306 = vmatpush.msrb.mxu0 %v1353_v1  ;;  %325 = vmatpush.msrb.mxu1 %v1354_v4  ;;  %v1364_v1 = vld [vmem:[#allocation75_spill] sm:$0xff]  ;;  %v1365_v4 = vld [vmem:[#allocation29_spill] sm:$0xff] }
  0xa3   : > { %348 = vmatpush.msrb.mxu2 %v1355_v8  ;;  %367 = vmatpush.msrb.mxu3 %v1356_v9  ;;  %v1366_v8 = vld [vmem:[#allocation77_spill] sm:$0xff]  ;;  %v441_v9 = vstv %s669_s14  ;;  %s209_s14 = sadd.s32 1, %s669_s14  }
  0xa4   : > { %307 = vmatpush.msrb.mxu0 %v1357_v10  ;;  %326 = vmatpush.msrb.mxu1 %v1358_v15  ;;  %v1367_v10 = vld [vmem:[#allocation22_spill] sm:$0xff]  ;;  %v1368_v15 = vld [vmem:[#allocation71_spill] sm:$0xff]  ;;  %p208_p3 = scmp.ge.s32.totalorder %s209_s14, %s1389_s0 }
  0xa5   : > { %349 = vmatpush.msrb.mxu2 %v1359_v6  ;;  %368 = vmatpush.msrb.mxu3 %v1360_v3  ;;  %v1369_v6 = vld [vmem:[#allocation25_spill] sm:$0xff]  ;;  %v1370_v3 = vld [vmem:[#allocation74_spill] sm:$0xff] }
  0xa6   : > { %308 = vmatpush.msrb.mxu0 %v1361_v11  ;;  %327 = vmatpush.msrb.mxu1 %v1362_v7  ;;  %v1371_v11 = vld [vmem:[#allocation18_spill] sm:$0xff]  ;;  %v1372_v7 = vld [vmem:[#allocation67_spill] sm:$0xff] }
  0xa7   : > { %350 = vmatpush.msrb.mxu2 %v1363_v0  ;;  %369 = vmatpush.msrb.mxu3 %v1364_v1  ;;  %v1373_v0 = vld [vmem:[#allocation14_spill] sm:$0xff]  ;;  %v1374_v1 = vld [vmem:[#allocation21_spill] sm:$0xff] }
  0xa8   : > { %309 = vmatpush.msrb.mxu0 %v1365_v4  ;;  %328 = vmatpush.msrb.mxu1 %v1366_v8  ;;  %vm442_vm0 = vcmp.lt.s32.totalorder %v441_v9, %v1373_v0  ;;  %v1375_v4 = vld [vmem:[#allocation70_spill] sm:$0xff]  ;;  %v1376_v8 = vld [vmem:[#allocation63_spill] sm:$0xff] }
  0xa9   : > { %351 = vmatpush.msrb.mxu2 %v1367_v10  ;;  %370 = vmatpush.msrb.mxu3 %v1368_v15  ;;  %v1377_v10 = vld [vmem:[#allocation17_spill] sm:$0xff]  ;;  %v1378_v15 = vld [vmem:[#allocation66_spill] sm:$0xff] }
  0xaa   : > { %310 = vmatpush.msrb.mxu0 %v1369_v6  ;;  %329 = vmatpush.msrb.mxu1 %v1370_v3  ;;  %v682_v6 = vmov 0  }
  0xab   : > { %352 = vmatpush.msrb.mxu2 %v1371_v11  ;;  %371 = vmatpush.msrb.mxu3 %v1372_v7  ;;  %v443_v3 = vsel %vm442_vm0, 1, %v682_v6  ;;  %v1379_v11 = vld [vmem:[#allocation62_spill] sm:$0xff]  ;;  %v1380_v7 = vperm.slane %v995_v57, 1 }
  0xac   : > { %311 = vmatpush.msrb.mxu0 %v1374_v1  ;;  %330 = vmatpush.msrb.mxu1 %v1375_v4  ;;  %v1381_v4 = vperm.slane %v995_v57, 0 }
  0xad   : > { %353 = vmatmul.f32.vlgmr.msrb.gmra.mxu2 %v1088_v2  ;;  %372 = vmatpush.msrb.mxu3 %v1376_v8 }
  0xae   : > { %312 = vmatpush.msrb.mxu0 %v1377_v10  ;;  %331 = vmatpush.msrb.mxu1 %v1378_v15 }
  0xaf   : > { %373 = vmatmul.f32.vlgmr.msrb.gmra.mxu3 %v665_v5  ;;  %313 = vmatmul.f32.vlgmr.msrb.gmra.mxu0 %v1088_v2 }
  0xb0   : > { %332 = vmatpush.msrb.mxu1 %v1379_v11  ;;  %544 = vset.pattern.permute.xlu0 %v682_v6 }
  0xb1   : > { %333 = vmatmul.f32.vlgmr.msrb.gmra.mxu1 %v665_v5  ;;  %445 = vperm.xlu0 %544, %v443_v3  }
 0x114   : > { %v274_v9 = vpop.f32.mrf.mxu2 }
 0x115   : > { %v275_v0 = vadd.f32 %v274_v9, %v1380_v7 }
 0x116   : > { %v234_v1 = vpop.f32.mrf.mxu0 }
 0x117   : > { %v235_v8 = vadd.f32 %v234_v1, %v1381_v4  ;;  %v294_v10 = vpop.f32.mrf.mxu3  ;;  %v1382_v4 = vperm.slane %v995_v57, 2 }
 0x118   : > { %v254_v15 = vpop.f32.mrf.mxu1  ;;  %v295_v12 = vadd.f32 %v294_v10, %v275_v0 }
 0x119   : > { %v255_v13 = vadd.f32 %v254_v15, %v235_v8 }
 0x11a   : > { %v491_v14 = vmul.f32 -1.442695, %v295_v12 }
 0x11b   : > { %v490_v2 = vmul.f32 -1.442695, %v255_v13 }
 0x11c   : > { %545 = vpow2.f32 %v491_v14 }
 0x11d   : > { %547 = vpow2.f32 %v490_v2 }
 0x122   : > { %v546_v6 = vpop.eup %545 }
 0x123   : > { %v548_v11 = vpop.eup %547  ;;  %v399_v16 = vadd.f32 1.0, %v546_v6 }
 0x124   : > { %v380_v3 = vadd.f32 1.0, %v548_v11 }
 0x125   : > { %549 = vrcp.f32 %v399_v16  ;;  %vm405_vm1 = vweird.f32 %v399_v16  ;;  %v409_v8 = vand.u32 2147483647, %v399_v16  ;;  %v411_v12 = vand.u32 2147483648, %v399_v16 }
 0x126   : > { %551 = vrcp.f32 %v380_v3  ;;  %vm386_vm2 = vweird.f32 %v380_v3  ;;  %v392_v10 = vand.u32 2147483648, %v380_v3  ;;  %v390_v6 = vand.u32 2147483647, %v380_v3 }
 0x127   : > { %vm410_vm7 = vcmp.eq.f32.partialorder %v409_v8, 8.507059e+37 }
 0x128   : > { %vm391_vm8 = vcmp.eq.f32.partialorder %v390_v6, 8.507059e+37 }
 0x12b   : > { %v550_v17 = vpop.eup %549 }
 0x12c   : > { %v552_v9 = vpop.eup %551  ;;  %v401_v7 = vmul.f32 %v550_v17, %v399_v16  ;;  %v314_v18 = vpop.f32.mrf.mxu0  ;;  %vm406_vm3 = vweird.f32 %v550_v17 }
 0x12d   : > { %v382_v1 = vmul.f32 %v552_v9, %v380_v3  ;;  %v315_v0 = vadd.f32 %v314_v18, %v1382_v4  ;;  %vm387_vm4 = vweird.f32 %v552_v9  ;;  %vm407_vm5 = vmor %vm405_vm1, %vm406_vm3  ;;  %v412_v18 = vor.u32 1.1754944e-38, %v411_v12 }
 0x12e   : > { %v402_v13 = vsub.f32 1.0, %v401_v7  ;;  %v334_v14 = vpop.f32.mrf.mxu1  ;;  %vm388_vm6 = vmor %vm386_vm2, %vm387_vm4  ;;  %v393_v7 = vor.u32 1.1754944e-38, %v392_v10 }
 0x12f   : > { %v383_v15 = vsub.f32 1.0, %v382_v1  ;;  %v335_v2 = vadd.f32 %v334_v14, %v315_v0 }
 0x130   : > { %v354_v11 = vpop.f32.mrf.mxu2  ;;  %v403_v19 = vmul.f32 %v550_v17, %v402_v13 }
 0x131   : > { %v384_v20 = vmul.f32 %v552_v9, %v383_v15  ;;  %553 = vtanh.f32 %v335_v2  ;;  %v355_v22 = vadd.f32 %v354_v11, %v1383_v21  ;;  %v446_v2 = vpop.permute.xlu0 %445 }
 0x132   : > { %v374_v4 = vpop.f32.mrf.mxu3  ;;  %v404_v23 = vadd.f32 %v550_v17, %v403_v19  ;;  %vm447_vm9 = vcmp.eq.s32.totalorder %v446_v2, 1 }
 0x133   : > { %v385_v24 = vadd.f32 %v552_v9, %v384_v20  ;;  %v375_v1 = vadd.f32 %v374_v4, %v355_v22 }
 0x134   : > { %v408_v0 = vsel %vm407_vm5, %v550_v17, %v404_v23 }
 0x135   : > { %v389_v3 = vsel %vm388_vm6, %v552_v9, %v385_v24  ;;  %v492_v14 = vmul.f32 -1.442695, %v375_v1  ;;  %v413_v13 = vsel %vm410_vm7, %v412_v18, %v408_v0 }
 0x136   : > { %v394_v15 = vsel %vm391_vm8, %v393_v7, %v389_v3  ;;  %v435_v25 = vmul.f32 %v661_v39, %v413_v13 }
 0x137   : > { %v554_v21 = vpop.eup %553  ;;  %555 = vpow2.f32 %v492_v14 }
 0x138   : > { %v436_v16 = vmul.f32 %v554_v21, %v394_v15 }
 0x13a   : > { %v437_v12 = vadd.f32 %v436_v16, %v435_v25 }
 0x13c   : > { %v449_v39 = vsel %vm447_vm9, %v437_v12, %v661_v39  }
 0x13d   : > { %v556_v19 = vpop.eup %555 }
 0x13e   : > { %v419_v20 = vadd.f32 1.0, %v556_v19 }
 0x140   : > { %557 = vrcp.f32 %v419_v20  ;;  %v431_v24 = vand.u32 2147483648, %v419_v20  ;;  %v429_v8 = vand.u32 2147483647, %v419_v20  ;;  %vm425_vm11 = vweird.f32 %v419_v20 }
 0x141   : > { %559 = vtanh.f32 %v437_v12 }
 0x142   : > { %v432_v6 = vor.u32 1.1754944e-38, %v431_v24  ;;  %vm430_vm13 = vcmp.eq.f32.partialorder %v429_v8, 8.507059e+37 }
 0x146   : > { %v558_v22 = vpop.eup %557 }
 0x147   : > { %v421_v17 = vmul.f32 %v558_v22, %v419_v20  ;;  %vm426_vm10 = vweird.f32 %v558_v22  ;;  %v560_v25 = vpop.eup %559 }
 0x148   : > { %vm427_vm12 = vmor %vm425_vm11, %vm426_vm10 }
 0x149   : > { %v422_v23 = vsub.f32 1.0, %v421_v17 }
 0x14b   : > { %v423_v9 = vmul.f32 %v558_v22, %v422_v23 }
 0x14d   : > { %v424_v10 = vadd.f32 %v558_v22, %v423_v9 }
 0x14f   : > { %v428_v11 = vsel %vm427_vm12, %v558_v22, %v424_v10 }
 0x150   : > { %v433_v18 = vsel %vm430_vm13, %v432_v6, %v428_v11  ;;  %211 = sbr.rel (!%p208_p3) target bundleno = 108 (0x6c), region = 56 }
 0x151   : > { %v439_v7 = vmul.f32 %v560_v25, %v433_v18 }
 0x153   : > { %v448_v4 = vsel %vm447_vm9, %v439_v7, %v665_v5  }
 0x154   : > { %v1384_v5 = vmov %v448_v4  ;;  %v1385_v6 = vmov (%p208_p3), %v448_v4 }
 0x155 PF:  { %450 = vst [vmem:[#allocation10] sm:$0xff] %v673_v6  ;;  %s459_s18 = sshll.u32 %s1193_s5, 4  ;;  %s683_s19 = smov [#allocation10]   ;;  %v673_v6 = vphi %v1002_v6, %v1385_v6   ;;  %s460_s18 = int_to_ptr.hbm [resolvable:$true] %s459_s18 }
 0x156   :  { %s457_s20 = sshll.u32 %s683_s19, 4  ;;  %s458_s20 = int_to_ptr.vmem [resolvable:$true] %s457_s20 }
 0x157   :  { %462 = dma.vmem_to_hbm [thread:$0]  %s458_s20, 128, %s460_s18, [#allocation7]  }
 0x158   :  { %657 = dma.done.wait [#allocation7], 128  }
 0x159   :  { %658 = vsyncadd [#allocation7], 4294967168 }
 0x15a   :  { %467 = vsyncpa [#allocation6], 1 }
 0x15b   :  { %468 = vsyncpa [#allocation9], 1 }
 0x15c   :  { %469 = vsyncpa [#allocation7], 1 }

</bundles_post_ra>
